<compile_context>
chip_gen: v6e
topology: v6e:2x2x1
jax: 0.10.0
libtpu: 0.0.40
codegen_flags: <defaults>
</compile_context>

<pallas_src>
import functools

import jax
import jax.numpy as jnp
from jax.experimental import pallas as pl
from jax.experimental.pallas import tpu as pltpu


def _round_up(x, m):
    return (x + m - 1) // m * m


def _pick_tile(n, candidates):
    for c in candidates:
        if c <= n and n % c == 0:
            return c
    return n


# ----------------------------------------------------------------------------
# Row- and column-tiled GEMM + bias kernel (input projection and vocab FC).
# bf16 MXU operands, f32 accumulation, f32 output.
# ----------------------------------------------------------------------------
def _matmul_bias_kernel(x_ref, w_ref, b_ref, o_ref):
    x = x_ref[...].astype(jnp.bfloat16)          # cast inside kernel (VPU, hidden under MXU)
    acc = jnp.dot(x, w_ref[...], preferred_element_type=jnp.float32)
    o_ref[...] = (acc + b_ref[...]).astype(o_ref.dtype)


def _matmul_bias(x, w, b, *, cols_outer=False):
    """(N, K) @ (K, M) + (1, M) -> (N, M) float32.

    M must already be a multiple of 128 (caller pads the weight/bias).
    Rows are padded to a multiple of 8 internally and sliced back.
    cols_outer=True puts the output/N (e.g. vocab) axis on the OUTER grid dim
    so each large weight column tile is fetched from HBM only once.
    """
    n, k = x.shape
    k2, m = w.shape
    assert k == k2 and m % 128 == 0, (x.shape, w.shape)

    n_pad = _round_up(max(n, 8), 8)
    if n_pad != n:
        x = jnp.pad(x, ((0, n_pad - n), (0, 0)))

    bm = _pick_tile(n_pad, (512, 256, 128, 64, 32, 16, 8))
    bn = _pick_tile(m, (2048, 1024, 512, 256, 128))

    if cols_outer:                       # grid = (cols, rows)
        grid = (m // bn, n_pad // bm)
        x_map = lambda j, i: (i, 0)
        w_map = lambda j, i: (0, j)
        o_map = lambda j, i: (i, j)
    else:                                # grid = (rows, cols)
        grid = (n_pad // bm, m // bn)
        x_map = lambda i, j: (i, 0)
        w_map = lambda i, j: (0, j)
        o_map = lambda i, j: (i, j)

    # Double-buffered VMEM footprint for this tiling (+ headroom), capped at
    # v7x's 64 MiB physical per-TC VMEM.
    xb = jnp.dtype(x.dtype).itemsize
    est = 2 * (bm * k * xb + k * bn * 2 + bn * 4 + bm * bn * 4)
    vmem_limit = int(min(max(est * 5 // 4, 16 << 20), 64 << 20))

    out = pl.pallas_call(
        _matmul_bias_kernel,
        out_shape=jax.ShapeDtypeStruct((n_pad, m), jnp.float32),
        grid=grid,
        in_specs=[
            pl.BlockSpec((bm, k), x_map),    # activations (f32 or bf16)
            pl.BlockSpec((k, bn), w_map),    # weight (bf16)
            pl.BlockSpec((1, bn), b_map := w_map),   # bias (f32)
        ],
        out_specs=pl.BlockSpec((bm, bn), o_map),
        compiler_params=pltpu.CompilerParams(
            dimension_semantics=("parallel", "parallel"),
            vmem_limit_bytes=vmem_limit,
        ),
    )(x, w, b)
    return out[:n] if n_pad != n else out


# ----------------------------------------------------------------------------
# LSTM recurrence kernel: one grid step == Tc time steps (chunked, unrolled).
# Only h @ W_hh is computed here; x @ W_ih + bias arrives precomputed.
# ----------------------------------------------------------------------------
def _lstm_kernel(gates_ref, whh_ref, h_out_ref, h_ref, c_ref, *, hidden, chunk):
    @pl.when(pl.program_id(0) == 0)
    def _():
        # nn.LSTM default: zero initial hidden/cell state.
        h_ref[...] = jnp.zeros_like(h_ref)
        c_ref[...] = jnp.zeros_like(c_ref)

    H = hidden

    def step(s, carry):
        h = h_ref[...]                    # (B, H) f32
        c = c_ref[...]                    # (B, H) f32
        # Recurrent half of the gates: bf16 MXU matmul, f32 accumulate.
        # NOTE: bf16 cast of h compounds small error over long sequences.
        rec = jnp.dot(h.astype(whh_ref.dtype), whh_ref[...],
                      preferred_element_type=jnp.float32)          # (B, 4H)
        gates = gates_ref[s] + rec                                  # precomputed + recurrent
        # H is a multiple of 128 -> every gate slice is lane-aligned.
        i_g = jax.nn.sigmoid(gates[:, 0 * H:1 * H])
        f_g = jax.nn.sigmoid(gates[:, 1 * H:2 * H])
        g_g = jnp.tanh(gates[:, 2 * H:3 * H])
        o_g = jax.nn.sigmoid(gates[:, 3 * H:4 * H])
        c_new = f_g * c + i_g * g_g
        h_new = o_g * jnp.tanh(c_new)
        c_ref[...] = c_new
        h_ref[...] = h_new
        h_out_ref[s] = h_new.astype(h_out_ref.dtype)   # bf16, feeds the FC GEMM
        return carry

    jax.lax.fori_loop(0, chunk, step, 0, unroll=True)


# ----------------------------------------------------------------------------
# Wrapper: replicates DecoderRNN.forward(features, captions).
# ----------------------------------------------------------------------------
def decoder_rnn_forward(features, captions, params):
    """features: (B, E) f32, captions: (B, T_cap) int32 -> (B, T_cap, V) f32."""
    E = params["w_ih"].shape[1]
    H = params["w_hh"].shape[1]
    V = params["fc_w"].shape[0]
    H_p = _round_up(H, 128)
    V_p = _round_up(V, 128)
    cd = jnp.bfloat16  # MXU operand dtype

    # ---- parameter prep: per-gate lane-aligned padding, bf16 weights -------
    # Gate order [i, f, g, o]; each gate occupies a lane-aligned H_p block.
    wih = (jnp.zeros((E, 4, H_p), jnp.float32)
           .at[:, :, :H].set(params["w_ih"].T.reshape(E, 4, H))
           .reshape(E, 4 * H_p).astype(cd))                          # (E, 4H_p)
    whh = (jnp.zeros((H_p, 4, H_p), jnp.float32)
           .at[:H, :, :H].set(params["w_hh"].T.reshape(H, 4, H))
           .reshape(H_p, 4 * H_p).astype(cd))                        # (H_p, 4H_p)
    b = (jnp.zeros((4, H_p), jnp.float32)
         .at[:, :H].set((params["b_ih"] + params["b_hh"]).reshape(4, H))
         .reshape(1, 4 * H_p))                                       # (1, 4H_p) f32
    wfc = (jnp.zeros((H_p, V_p), jnp.float32)
           .at[:H, :V].set(params["fc_w"].T).astype(cd))             # (H_p, V_p)
    bfc = jnp.zeros((1, V_p), jnp.float32).at[0, :V].set(params["fc_b"])

    # ---- glue (plain JAX): embedding lookup + concat, time-major layout ----
    cap = captions[:, :-1]                                           # (B, T-1)
    cap_emb = jnp.take(params["embedding"], cap, axis=0)             # (B, T-1, E)
    emb = jnp.concatenate([features[:, None, :], cap_emb], axis=1)   # (B, T, E)
    B, T, _ = emb.shape
    x_tm = jnp.transpose(emb, (1, 0, 2)).reshape(T * B, E)           # (T*B, E) f32

    # 1) Hoisted input projection: one big GEMM, bias folded in.
    gates_pre = _matmul_bias(x_tm, wih, b, cols_outer=False)         # (T*B, 4H_p) f32
    gates_tm = gates_pre.reshape(T, B, 4 * H_p)                      # (T, B, 4H_p)

    # 2) Chunked serial LSTM recurrence (Tc steps per grid iteration).
    Tc = 8
    while Tc > 1 and 2 * (Tc * B * 4 * H_p * 4 + Tc * B * H_p * 2) > (24 << 20):
        Tc //= 2
    T_pad = _round_up(T, Tc)
    if T_pad != T:
        gates_tm = jnp.pad(gates_tm, ((0, T_pad - T), (0, 0), (0, 0)))

    lstm_vmem = int(min(max(
        2 * (Tc * B * 4 * H_p * 4 + H_p * 4 * H_p * 2 + Tc * B * H_p * 2)
        + 2 * B * H_p * 4 + (4 << 20), 16 << 20), 64 << 20))

    h_tm = pl.pallas_call(
        functools.partial(_lstm_kernel, hidden=H_p, chunk=Tc),
        out_shape=jax.ShapeDtypeStruct((T_pad, B, H_p), jnp.bfloat16),
        grid=(T_pad // Tc,),
        in_specs=[
            pl.BlockSpec((Tc, B, 4 * H_p), lambda t: (t, 0, 0)),  # precomputed gates
            pl.BlockSpec((H_p, 4 * H_p), lambda t: (0, 0)),       # W_hh^T (bf16)
        ],
        out_specs=pl.BlockSpec((Tc, B, H_p), lambda t: (t, 0, 0)),
        scratch_shapes=[
            pltpu.VMEM((B, H_p), jnp.float32),   # h state
            pltpu.VMEM((B, H_p), jnp.float32),   # c state
        ],
        compiler_params=pltpu.CompilerParams(
            dimension_semantics=("arbitrary",),   # recurrence over time
            vmem_limit_bytes=lstm_vmem,
        ),
    )(gates_tm, whh)

    # 3) Vocab FC as one big GEMM over all (B*T) rows.  Only the small
    #    (T,B,H_p) bf16 hidden tensor is transposed; logits come out
    #    batch-first directly.  Vocab axis goes OUTER when B*T < V_p.
    h_bt = jnp.transpose(h_tm[:T], (1, 0, 2)).reshape(B * T, H_p)    # bf16
    logits = _matmul_bias(h_bt, wfc, bfc, cols_outer=(B * T < V_p))  # (B*T, V_p) f32
    return logits[:, :V].reshape(B, T, V)


# ----------------------------------------------------------------------------
# Pure-JAX f32 reference (mirrors the PyTorch module) for verification.
# ----------------------------------------------------------------------------
def decoder_rnn_reference(features, captions, params):
    cap = captions[:, :-1]
    cap_emb = jnp.take(params["embedding"], cap, axis=0)
    emb = jnp.concatenate([features[:, None, :], cap_emb], axis=1)   # (B, T, E)
    B, T, _ = emb.shape
    H = params["w_hh"].shape[1]

    def step(carry, x_t):
        h, c = carry
        gates = (x_t @ params["w_ih"].T + params["b_ih"]
                 + h @ params["w_hh"].T + params["b_hh"])
        i_g = jax.nn.sigmoid(gates[:, 0 * H:1 * H])
        f_g = jax.nn.sigmoid(gates[:, 1 * H:2 * H])
        g_g = jnp.tanh(gates[:, 2 * H:3 * H])
        o_g = jax.nn.sigmoid(gates[:, 3 * H:4 * H])
        c_new = f_g * c + i_g * g_g
        h_new = o_g * jnp.tanh(c_new)
        return (h_new, c_new), h_new

    h0 = jnp.zeros((B, H), jnp.float32)
    c0 = jnp.zeros((B, H), jnp.float32)
    (_, _), hs = jax.lax.scan(step, (h0, c0), jnp.transpose(emb, (1, 0, 2)))
    hs = jnp.transpose(hs, (1, 0, 2))                                 # (B, T, H)
    return hs @ params["fc_w"].T + params["fc_b"]


def init_params(key, embed_size, hidden_size, vocab_size):
    ks = jax.random.split(key, 7)
    s = 1.0 / jnp.sqrt(hidden_size)
    return {
        "embedding": jax.random.normal(ks[0], (vocab_size, embed_size), jnp.float32),
        "w_ih": jax.random.uniform(ks[1], (4 * hidden_size, embed_size), jnp.float32, -s, s),
        "w_hh": jax.random.uniform(ks[2], (4 * hidden_size, hidden_size), jnp.float32, -s, s),
        "b_ih": jax.random.uniform(ks[3], (4 * hidden_size,), jnp.float32, -s, s),
        "b_hh": jax.random.uniform(ks[4], (4 * hidden_size,), jnp.float32, -s, s),
        "fc_w": jax.random.uniform(ks[5], (vocab_size, hidden_size), jnp.float32, -s, s),
        "fc_b": jax.random.uniform(ks[6], (vocab_size,), jnp.float32, -s, s),
    }


if __name__ == "__main__":
    embed_size, hidden_size, vocab_size = 32, 32, 64
    batch, cap_len = 2, 8   # sequence length T = 1 + (cap_len - 1) = 8

    key = jax.random.PRNGKey(0)
    k_par, k_feat, k_cap = jax.random.split(key, 3)

    params = init_params(k_par, embed_size, hidden_size, vocab_size)
    features = jax.random.normal(k_feat, (batch, embed_size), jnp.float32)
    captions = jax.random.randint(k_cap, (batch, cap_len), 0, vocab_size, jnp.int32)

    out = decoder_rnn_forward(features, captions, params)
    out = jax.block_until_ready(out)

    ref = decoder_rnn_reference(features, captions, params)
    assert out.shape == (batch, cap_len, vocab_size), out.shape
    # bf16 MXU operands vs f32 reference -> loosened tolerance.
    max_err = float(jnp.max(jnp.abs(out - ref)))
    assert jnp.allclose(out, ref, rtol=5e-2, atol=5e-2), max_err

    print("KERNEL_OK")
</pallas_src>

<mosaic_0001>
module attributes {stable_mosaic.version = 11 : i64} {
  func.func @_matmul_bias_kernel(%arg0: i32, %arg1: i32, %arg2: memref<16x32xf32, #tpu.memory_space<vmem>>, %arg3: memref<32x512xbf16, #tpu.memory_space<vmem>>, %arg4: memref<1x512xf32, #tpu.memory_space<vmem>>, %arg5: memref<16x512xf32, #tpu.memory_space<vmem>>) attributes {dimension_semantics = [#tpu.dimension_semantics<parallel>, #tpu.dimension_semantics<parallel>], iteration_bounds = array<i64: 1, 1>, scalar_prefetch = 0 : i64, scratch_operands = 0 : i64, tpu.core_type = #tpu.core_type<tc>, window_params = [{transform_indices = @transform_0, window_bounds = array<i64: 16, 32>}, {transform_indices = @transform_1, window_bounds = array<i64: 32, 512>}, {transform_indices = @transform_2, window_bounds = array<i64: 1, 512>}, {transform_indices = @transform_3, window_bounds = array<i64: 16, 512>}]} {
    %c0 = arith.constant 0 : index
    %c0_0 = arith.constant 0 : index
    %0 = vector.load %arg2[%c0, %c0_0] : memref<16x32xf32, #tpu.memory_space<vmem>>, vector<16x32xf32>
    %1 = arith.truncf %0 : vector<16x32xf32> to vector<16x32xbf16>
    %c0_1 = arith.constant 0 : index
    %c0_2 = arith.constant 0 : index
    %2 = vector.load %arg3[%c0_1, %c0_2] : memref<32x512xbf16, #tpu.memory_space<vmem>>, vector<32x512xbf16>
    %cst = arith.constant dense<0.000000e+00> : vector<16x512xf32>
    %3 = tpu.matmul %1, %2, %cst {dimension_numbers = #tpu.dot_dimension_numbers<[1], [0], [0], [1], [0, 0, 1, 1], [], []>} : vector<16x32xbf16>, vector<32x512xbf16>, vector<16x512xf32> -> vector<16x512xf32>
    %c0_3 = arith.constant 0 : index
    %c0_4 = arith.constant 0 : index
    %4 = vector.load %arg4[%c0_3, %c0_4] : memref<1x512xf32, #tpu.memory_space<vmem>>, vector<1x512xf32>
    %5 = vector.broadcast %4 : vector<1x512xf32> to vector<16x512xf32>
    %6 = arith.addf %3, %5 : vector<16x512xf32>
    %c0_5 = arith.constant 0 : index
    %c0_6 = arith.constant 0 : index
    %7 = vector.load %arg5[%c0_5, %c0_6] : memref<16x512xf32, #tpu.memory_space<vmem>>, vector<16x512xf32>
    tpu.vector_store %arg5[%c0_5, %c0_6], %6 {strides = array<i32>} : memref<16x512xf32, #tpu.memory_space<vmem>>, vector<16x512xf32>,
    return
  }
  func.func @transform_0(%arg0: i32, %arg1: i32) -> (i32, i32) {
    %c0_i32 = arith.constant 0 : i32
    %c0_i32_0 = arith.constant 0 : i32
    return %arg0, %c0_i32 : i32, i32
  }
  func.func @transform_1(%arg0: i32, %arg1: i32) -> (i32, i32) {
    %c0_i32 = arith.constant 0 : i32
    %c0_i32_0 = arith.constant 0 : i32
    return %c0_i32, %arg1 : i32, i32
  }
  func.func @transform_2(%arg0: i32, %arg1: i32) -> (i32, i32) {
    %c0_i32 = arith.constant 0 : i32
    %c0_i32_0 = arith.constant 0 : i32
    return %c0_i32, %arg1 : i32, i32
  }
  func.func @transform_3(%arg0: i32, %arg1: i32) -> (i32, i32) {
    %c0_i32 = arith.constant 0 : i32
    return %arg0, %arg1 : i32, i32
  }
}

</mosaic_0001>

<bundles_post_ra>
// kernel: tpu_custom_call.1
= control target key start
LH: loop header
LB: loop body
LE: loop exit
PB: predicated region body
PF: predicated region fallthrough
CT: control target
= control target key end

     0   :  { %8 = vsyncpa [#allocation3], 0  ;;  %s406_s0 = inlined_call_operand.hbm [shape: f32[16,32], index: 0, kind: input, shape index: {}]   ;;  %s407_s1 = inlined_call_operand.hbm [shape: bf16[32,512], index: 1, kind: input, shape index: {}]   ;;  %s408_s2 = inlined_call_operand.hbm [shape: f32[1,512], index: 2, kind: input, shape index: {}]   ;;  %s409_s3 = inlined_call_operand.hbm [shape: f32[16,512], index: 3, kind: output, shape index: {}]  }
   0x1   :  { %9 = vsyncpa [#allocation6], 0 }
   0x2   :  { %10 = vsyncpa [#allocation4], 0  ;;  %s363_s12 = smov [#allocation5]  }
   0x3   :  { %s28_s13 = sshll.u32 %s363_s12, 4  ;;  %s29_s13 = int_to_ptr.vmem [resolvable:$true] %s28_s13 }
   0x4   :  { %s285_s14 = scalar_lea.vmem %s29_s13, 1024  ;;  %p290_p1 = scmp.lt.s32.totalorder %s29_s13, %s29_s13 }
   0x5   :  { %p286_p0 = scmp.ne.s32.totalorder %s29_s13, %s285_s14  ;;  %p291_p2 = scmp.lt.s32.totalorder %s285_s14, %s285_s14 }
   0x7   :  { %p292_p3 = por %p291_p2, %p290_p1 }
   0x9   :  { %p293_p4 = pnand %p292_p3, %p286_p0 }
   0xb   :  { %296 = shalt.err (!%p293_p4)
}
   0xc   :  { %s364_s15 = smov 256   ;;  %s365_s16 = smov 16  }
   0xd   :  { %34 = dma.hbm_to_vmem [thread:$0]  %s407_s1, 1024, %s29_s13, [#allocation6], %s364_s15, %s364_s15, %s365_s16  }
   0xe   :  { %s366_s19 = smov [#allocation2]  }
   0xf   :  { %s16_s20 = sshll.u32 %s366_s19, 4  ;;  %s17_s20 = int_to_ptr.vmem [resolvable:$true] %s16_s20 }
  0x10   :  { %s305_s21 = scalar_lea.vmem %s17_s20, 256  ;;  %p310_p6 = scmp.lt.s32.totalorder %s17_s20, %s17_s20 }
  0x11   :  { %p306_p5 = scmp.ne.s32.totalorder %s17_s20, %s305_s21  ;;  %p311_p7 = scmp.lt.s32.totalorder %s305_s21, %s305_s21 }
  0x13   :  { %p312_p8 = por %p311_p7, %p310_p6 }
  0x15   :  { %p313_p9 = pnand %p312_p8, %p306_p5 }
  0x17   :  { %316 = shalt.err (!%p313_p9)
}
  0x18   :  { %s367_s22 = smov 128   ;;  %s368_s23 = smov 8  }
  0x19   :  { %22 = dma.hbm_to_vmem [thread:$0]  %s406_s0, 256, %s17_s20, [#allocation3], %s367_s22, %s367_s22, %s368_s23  }
  0x1a   :  { %s369_s26 = smov [#allocation7]  }
  0x1b   :  { %s41_s27 = sshll.u32 %s369_s26, 4  ;;  %s42_s27 = int_to_ptr.vmem [resolvable:$true] %s41_s27 }
  0x1c   :  { %s325_s1 = scalar_lea.vmem %s42_s27, 64  ;;  %p330_p11 = scmp.lt.s32.totalorder %s42_s27, %s42_s27 }
  0x1d   :  { %p326_p10 = scmp.ne.s32.totalorder %s42_s27, %s325_s1  ;;  %p331_p12 = scmp.lt.s32.totalorder %s325_s1, %s325_s1 }
  0x1f   :  { %p332_p13 = por %p331_p12, %p330_p11 }
  0x21   :  { %p333_p0 = pnand %p332_p13, %p326_p10 }
  0x23   :  { %336 = shalt.err (!%p333_p0)
}
  0x24   :  { %44 = dma.hbm_to_vmem [thread:$0]  %s408_s2, 64, %s42_s27, [#allocation6]  }
  0x25   :  { %357 = dma.done.wait [#allocation3], 256  }
  0x26   :  { %358 = vsyncadd [#allocation3], 4294967040 }
  0x27   :  { %359 = dma.done.wait [#allocation6], 1088  }
  0x28   :  { %360 = vsyncadd [#allocation6], 4294966208  ;;  %v370_v0 = vmov 0   ;;  %v265_v1 = vld [vmem:[#allocation5 + $0x24] ss:$16 sps:$4 sm:$0xff]   ;;  %v56_v10 = vld [vmem:[#allocation2 + $0x8] sm:$0xff]  ;;  %v68_v12 = vlaneseq }
  0x29   :  { %164 = vmatprep.mubr.bf16.mxu0 %v370_v0  ;;  %207 = vmatprep.mubr.bf16.mxu1 %v370_v0  ;;  %v267_v2 = vld [vmem:[#allocation5 + $0x2c] ss:$16 sps:$4 sm:$0xff]   ;;  %v269_v3 = vld [vmem:[#allocation5 + $0x20] ss:$16 sps:$4 sm:$0xff]   ;;  %v270_v4 = vld [vmem:[#allocation5 + $0x28] ss:$16 sps:$4 sm:$0xff]  }
  0x2a   :  { %144 = vmatprep.subr.bf16.mxu0 %v265_v1  ;;  %187 = vmatprep.subr.bf16.mxu1 %v267_v2  ;;  %v271_v5 = vld [vmem:[#allocation5 + $0x4] ss:$16 sps:$4 sm:$0xff]   ;;  %v273_v6 = vld [vmem:[#allocation5 + $0xc] ss:$16 sps:$4 sm:$0xff]   ;;  %v275_v7 = vld [vmem:[#allocation5] ss:$16 sps:$4 sm:$0xff]  }
  0x2b   :  { %145 = vmatpush1.bf16.msra.mxu0 %v269_v3  ;;  %188 = vmatpush1.bf16.msra.mxu1 %v270_v4  ;;  %v276_v8 = vld [vmem:[#allocation5 + $0x8] ss:$16 sps:$4 sm:$0xff]   ;;  %v55_v9 = vld [vmem:[#allocation2] sm:$0xff]  ;;  %vm128_vm0 = vcmask 261120   ;;  %v69_v13 = vshrl.u32 %v68_v12, 7  ;;  %s371_s0 = smov [#allocation8]  }
  0x2c   :  { %146 = vmatprep.subr.bf16.mxu0 %v271_v5  ;;  %189 = vmatprep.subr.bf16.mxu1 %v273_v6  ;;  %v57_v11 = vpack.c.bf16 %v56_v10, %v55_v9  ;;  %v66_v16 = vld [vmem:[#allocation7] sm:$0xf]  ;;  %s231_s2 = sshll.u32 %s371_s0, 4  ;;  %s232_s2 = int_to_ptr.vmem [resolvable:$true] %s231_s2 }
  0x2d   :  { %v70_v14 = vsub.s32 0, %v69_v13  ;;  %v78_v15 = vsub.s32 2, %v69_v13  ;;  %v74_v17 = vsub.s32 1, %v69_v13  ;;  %v82_v18 = vsub.s32 3, %v69_v13  ;;  %s337_s30 = scalar_lea.vmem %s232_s2, 1024  ;;  %p342_p2 = scmp.lt.s32.totalorder %s232_s2, %s232_s2 }
  0x2e   :  { %p338_p1 = scmp.ne.s32.totalorder %s232_s2, %s337_s30  ;;  %p343_p3 = scmp.lt.s32.totalorder %s337_s30, %s337_s30 }
  0x2f   :  { %147 = vmatpush1.bf16.msra.mxu0 %v275_v7  ;;  %190 = vmatpush1.bf16.msra.mxu1 %v276_v8  ;;  %v71_v19 = vrot.slane %v66_v16, %v70_v14  ;;  %v79_v20 = vrot.slane %v66_v16, %v78_v15  ;;  %v75_v21 = vrot.slane %v66_v16, %v74_v17 }
  0x30   :  { %v83_v22 = vrot.slane %v66_v16, %v82_v18  ;;  %p344_p4 = por %p343_p3, %p342_p2 }
  0x32   :  { %252 = vmatmul.mubr.msk.bf16.vlgmr.msra.gmra.mxu0 %vm128_vm0, %v57_v11  ;;  %253 = vmatmul.mubr.msk.bf16.vlgmr.msra.gmra.mxu1 %vm128_vm0, %v57_v11  ;;  %p345_p5 = pnand %p344_p4, %p338_p1 }
  0xf2   :  { %v166_v23 = vpop.f32.mrf.mxu0  ;;  %v209_v24 = vpop.f32.mrf.mxu1 }
  0xf3   :  { %v167_v25 = vadd.f32 %v166_v23, %v71_v19  ;;  %v210_v26 = vadd.f32 %v209_v24, %v79_v20 }
  0xf4   :  { %v168_v27 = vpop.f32.mrf.mxu0  ;;  %v211_v28 = vpop.f32.mrf.mxu1 }
  0xf5   :  { %218 = vst [vmem:[#allocation8] sm:$0xff] %v167_v25  ;;  %220 = vst [vmem:[#allocation8 + $0x10] sm:$0xff] %v210_v26  ;;  %v169_v29 = vadd.f32 %v168_v27, %v75_v21  ;;  %v212_v30 = vadd.f32 %v211_v28, %v83_v22 }
  0xf6   :  { %v170_v31 = vpop.f32.mrf.mxu0  ;;  %v213_v32 = vpop.f32.mrf.mxu1 }
  0xf7   :  { %219 = vst [vmem:[#allocation8 + $0x8] sm:$0xff] %v169_v29  ;;  %221 = vst [vmem:[#allocation8 + $0x18] sm:$0xff] %v212_v30  ;;  %v171_v33 = vadd.f32 %v170_v31, %v71_v19  ;;  %v214_v34 = vadd.f32 %v213_v32, %v79_v20 }
  0xf8   :  { %v172_v35 = vpop.f32.mrf.mxu0  ;;  %v215_v36 = vpop.f32.mrf.mxu1 }
  0xf9   :  { %222 = vst [vmem:[#allocation8 + $0x20] sm:$0xff] %v171_v33  ;;  %224 = vst [vmem:[#allocation8 + $0x30] sm:$0xff] %v214_v34  ;;  %v173_v37 = vadd.f32 %v172_v35, %v75_v21  ;;  %v216_v38 = vadd.f32 %v215_v36, %v83_v22 }
  0xfb   :  { %223 = vst [vmem:[#allocation8 + $0x28] sm:$0xff] %v173_v37  ;;  %225 = vst [vmem:[#allocation8 + $0x38] sm:$0xff] %v216_v38 }
  0xfc   :  { %348 = shalt.err (!%p345_p5)
}
  0xfd   :  { %s372_s4 = smov 512   ;;  %s373_s5 = smov 32  }
  0xfe   :  { %237 = dma.vmem_to_hbm [thread:$0]  %s232_s2, 1024, %s409_s3, [#allocation4], %s372_s4, %s372_s4, %s373_s5  }
  0xff   :  { %361 = dma.done.wait [#allocation4], 1024  }
 0x100   :  { %362 = vsyncadd [#allocation4], 4294966272 }
 0x101   :  { %241 = vsyncpa [#allocation3], 1 }
 0x102   :  { %242 = vsyncpa [#allocation6], 1 }
 0x103   :  { %243 = vsyncpa [#allocation4], 1 }

</bundles_post_ra>
